<compile_context>
chip_gen: v5e
topology: v5e:2x2
jax: 0.10.0
libtpu: 0.0.40
codegen_flags: <defaults>
</compile_context>

<pallas_src>
import functools

import jax
import jax.numpy as jnp
import numpy as np
from jax.experimental import pallas as pl
from jax.experimental.pallas import tpu as pltpu


def _resblock_kernel(x_ref, m_ref, w1_ref, b1_ref, w2_ref, b2_ref, o_ref, *, H, W):
    """One batch sample per grid step.

    x_ref : VMEM (1, C, H*W)    input activations (lane-dense spatial axis)
    m_ref : VMEM (9, H*W)       {0,1} border masks, one per 3x3 tap
    w*_ref: VMEM (C, 9*C)       conv weights, (co, tap, ci) i.e. tap-major/ci-minor
    b*_ref: VMEM (C, 1)         conv biases (broadcast over lanes)
    o_ref : VMEM (1, C, H*W)    output activations
    """
    C = x_ref.shape[1]
    HW = H * W

    x = x_ref[0].astype(jnp.float32)          # (C, HW)
    masks = m_ref[...]                        # (9, HW) of {0.0, 1.0}

    # Tap t = (ky, kx) reads pixel (y + ky - 1, x + kx - 1), i.e. flattened
    # index p + off with off = (ky - 1) * W + (kx - 1).
    offsets = [(ky - 1) * W + (kx - 1) for ky in range(3) for kx in range(3)]

    def taps_stack(a):
        # a: (C, HW) -> (9*C, HW), row index = t*C + ci (tap-major, ci-minor),
        # matching the (C, 9*C) weight layout.  8 full-block XLU rolls + 8
        # broadcast mask multiplies (center tap needs neither).
        rows = []
        for t, off in enumerate(offsets):
            if off == 0:
                rows.append(a)
            else:
                rolled = pltpu.roll(a, shift=(-off) % HW, axis=1)
                rows.append(rolled * masks[t:t + 1, :])
        return jnp.concatenate(rows, axis=0)   # (9*C, HW)

    def conv3x3_relu(a, w_ref, b_ref):
        taps = taps_stack(a)                                      # (9C, HW)
        y = jnp.dot(w_ref[...], taps,
                    preferred_element_type=jnp.float32)           # MXU: (C, HW)
        y = y + b_ref[...]                                        # (C,1) bcast add
        return jnp.maximum(y, 0.0)

    h = conv3x3_relu(x, w1_ref, b1_ref)        # conv1 + ReLU
    h = conv3x3_relu(h, w2_ref, b2_ref)        # conv2 + ReLU

    # Residual add + final ReLU; one dense full-tile store.
    out = jnp.maximum(x + h, 0.0)
    o_ref[0] = out.astype(o_ref.dtype)


def _border_masks(H, W):
    """(9, H*W) float32; mask[t, p] = 1 iff tap t of pixel p is inside the image."""
    masks = np.zeros((9, H * W), np.float32)
    t = 0
    for oy in (-1, 0, 1):
        for ox in (-1, 0, 1):
            m = np.zeros((H, W), np.float32)
            m[max(0, -oy): H - max(0, oy), max(0, -ox): W - max(0, ox)] = 1.0
            masks[t] = m.reshape(-1)
            t += 1
    return masks


@jax.jit
def resblock_pallas(x_nchw, w1_oihw, b1, w2_oihw, b2):
    """x: (N, C, H, W); w*: (C, C, 3, 3) OIHW; b*: (C,).  Returns (N, C, H, W)."""
    N, C, H, W = x_nchw.shape
    HW = H * W

    x_flat = x_nchw.reshape(N, C, HW)          # free reshape (stays NCHW-major)

    # OIHW -> (co, ky, kx, ci) -> (C, 9*C): row co, column t*C + ci.  Matches
    # the tap-major / ci-minor ordering of the (9*C, HW) taps stack.
    def w2d(w):
        return jnp.transpose(w, (0, 2, 3, 1)).reshape(C, 9 * C)

    w1_mat = w2d(w1_oihw)
    w2_mat = w2d(w2_oihw)
    b1_col = b1.reshape(C, 1)
    b2_col = b2.reshape(C, 1)
    masks = jnp.asarray(_border_masks(H, W))   # (9, HW) constants

    kernel = functools.partial(_resblock_kernel, H=H, W=W)

    out_flat = pl.pallas_call(
        kernel,
        out_shape=jax.ShapeDtypeStruct((N, C, HW), x_nchw.dtype),
        grid=(N,),
        in_specs=[
            pl.BlockSpec((1, C, HW), lambda n: (n, 0, 0)),   # x (VMEM)
            pl.BlockSpec((9, HW), lambda n: (0, 0)),         # masks (VMEM)
            pl.BlockSpec((C, 9 * C), lambda n: (0, 0)),      # w1 matrix (VMEM)
            pl.BlockSpec((C, 1), lambda n: (0, 0)),          # b1 column (VMEM)
            pl.BlockSpec((C, 9 * C), lambda n: (0, 0)),      # w2 matrix (VMEM)
            pl.BlockSpec((C, 1), lambda n: (0, 0)),          # b2 column (VMEM)
        ],
        out_specs=pl.BlockSpec((1, C, HW), lambda n: (n, 0, 0)),
        compiler_params=pltpu.CompilerParams(
            dimension_semantics=("parallel",),   # shard batch over TCs on v7x
        ),
        # TODO(synk): on single-TC v5e/v6e with tiny N*C, a single grid step
        # with (N*C, HW) sublane packing fills vregs better; and for much
        # larger C/H/W, tile spatially over rows with a 1-row halo (keep the
        # flattened lane dim a multiple of 128) and set vmem_limit_bytes
        # explicitly for v7x's 64 MiB VMEM.
    )(x_flat, masks, w1_mat, b1_col, w2_mat, b2_col)

    return out_flat.reshape(N, C, H, W)


if __name__ == "__main__":
    N, C, H, W = 2, 4, 16, 16
    key = jax.random.PRNGKey(0)
    k = jax.random.split(key, 5)

    x = jax.random.normal(k[0], (N, C, H, W), jnp.float32)

    # Deterministic PyTorch-style Conv2d init: U(-1/sqrt(fan_in), 1/sqrt(fan_in))
    fan_in = C * 3 * 3
    bound = float(1.0 / np.sqrt(fan_in))
    w1 = jax.random.uniform(k[1], (C, C, 3, 3), jnp.float32, -bound, bound)
    b1 = jax.random.uniform(k[2], (C,), jnp.float32, -bound, bound)
    w2 = jax.random.uniform(k[3], (C, C, 3, 3), jnp.float32, -bound, bound)
    b2 = jax.random.uniform(k[4], (C,), jnp.float32, -bound, bound)

    out = jax.block_until_ready(resblock_pallas(x, w1, b1, w2, b2))

    # Pure-JAX reference (same semantics as the PyTorch module).
    def conv_bias(inp, w, b):
        y = jax.lax.conv_general_dilated(
            inp, w, window_strides=(1, 1), padding="SAME",
            dimension_numbers=("NCHW", "OIHW", "NCHW"))
        return y + b[None, :, None, None]

    h1 = jnp.maximum(conv_bias(x, w1, b1), 0.0)
    h2 = jnp.maximum(conv_bias(h1, w2, b2), 0.0)
    ref = jnp.maximum(x + h2, 0.0)

    assert out.shape == (N, C, H, W)
    err = float(jnp.max(jnp.abs(out - ref)))
    assert err < 1e-4, f"max abs err {err}"
    print("KERNEL_OK")
</pallas_src>

<mosaic_0001>
module attributes {stable_mosaic.version = 11 : i64} {
  func.func @_resblock_kernel(%arg0: i32, %arg1: memref<1x4x256xf32, #tpu.memory_space<vmem>>, %arg2: memref<9x256xf32, #tpu.memory_space<vmem>>, %arg3: memref<4x36xf32, #tpu.memory_space<vmem>>, %arg4: memref<4x1xf32, #tpu.memory_space<vmem>>, %arg5: memref<4x36xf32, #tpu.memory_space<vmem>>, %arg6: memref<4x1xf32, #tpu.memory_space<vmem>>, %arg7: memref<1x4x256xf32, #tpu.memory_space<vmem>>) attributes {dimension_semantics = [#tpu.dimension_semantics<parallel>], iteration_bounds = array<i64: 2>, scalar_prefetch = 0 : i64, scratch_operands = 0 : i64, tpu.core_type = #tpu.core_type<tc>, window_params = [{transform_indices = @transform_0, window_bounds = array<i64: 1, 4, 256>}, {pipeline_mode = #tpu.pipeline_mode<synchronous>, transform_indices = @transform_1, window_bounds = array<i64: 9, 256>}, {pipeline_mode = #tpu.pipeline_mode<synchronous>, transform_indices = @transform_2, window_bounds = array<i64: 4, 36>}, {pipeline_mode = #tpu.pipeline_mode<synchronous>, transform_indices = @transform_3, window_bounds = array<i64: 4, 1>}, {pipeline_mode = #tpu.pipeline_mode<synchronous>, transform_indices = @transform_4, window_bounds = array<i64: 4, 36>}, {pipeline_mode = #tpu.pipeline_mode<synchronous>, transform_indices = @transform_5, window_bounds = array<i64: 4, 1>}, {transform_indices = @transform_6, window_bounds = array<i64: 1, 4, 256>}]} {
    %c0 = arith.constant 0 : index
    %c0_0 = arith.constant 0 : index
    %c0_1 = arith.constant 0 : index
    %0 = vector.load %arg1[%c0, %c0_0, %c0_1] : memref<1x4x256xf32, #tpu.memory_space<vmem>>, vector<1x4x256xf32>
    %1 = vector.shape_cast %0 : vector<1x4x256xf32> to vector<4x256xf32>
    %c0_2 = arith.constant 0 : index
    %c0_3 = arith.constant 0 : index
    %2 = vector.load %arg2[%c0_2, %c0_3] : memref<9x256xf32, #tpu.memory_space<vmem>>, vector<9x256xf32>
    %c17_i32 = arith.constant 17 : i32
    %3 = tpu.dynamic_rotate %1 by %c17_i32 dim 1 : vector<4x256xf32>, i32 -> vector<4x256xf32>
    %4 = vector.extract_strided_slice %2 {offsets = [0, 0], sizes = [1, 256], strides = [1, 1]} : vector<9x256xf32> to vector<1x256xf32>
    %5 = vector.broadcast %4 : vector<1x256xf32> to vector<4x256xf32>
    %6 = arith.mulf %3, %5 : vector<4x256xf32>
    %c16_i32 = arith.constant 16 : i32
    %7 = tpu.dynamic_rotate %1 by %c16_i32 dim 1 : vector<4x256xf32>, i32 -> vector<4x256xf32>
    %8 = vector.extract_strided_slice %2 {offsets = [1, 0], sizes = [1, 256], strides = [1, 1]} : vector<9x256xf32> to vector<1x256xf32>
    %9 = vector.broadcast %8 : vector<1x256xf32> to vector<4x256xf32>
    %10 = arith.mulf %7, %9 : vector<4x256xf32>
    %c15_i32 = arith.constant 15 : i32
    %11 = tpu.dynamic_rotate %1 by %c15_i32 dim 1 : vector<4x256xf32>, i32 -> vector<4x256xf32>
    %12 = vector.extract_strided_slice %2 {offsets = [2, 0], sizes = [1, 256], strides = [1, 1]} : vector<9x256xf32> to vector<1x256xf32>
    %13 = vector.broadcast %12 : vector<1x256xf32> to vector<4x256xf32>
    %14 = arith.mulf %11, %13 : vector<4x256xf32>
    %c1_i32 = arith.constant 1 : i32
    %15 = tpu.dynamic_rotate %1 by %c1_i32 dim 1 : vector<4x256xf32>, i32 -> vector<4x256xf32>
    %16 = vector.extract_strided_slice %2 {offsets = [3, 0], sizes = [1, 256], strides = [1, 1]} : vector<9x256xf32> to vector<1x256xf32>
    %17 = vector.broadcast %16 : vector<1x256xf32> to vector<4x256xf32>
    %18 = arith.mulf %15, %17 : vector<4x256xf32>
    %c255_i32 = arith.constant 255 : i32
    %19 = tpu.dynamic_rotate %1 by %c255_i32 dim 1 : vector<4x256xf32>, i32 -> vector<4x256xf32>
    %20 = vector.extract_strided_slice %2 {offsets = [5, 0], sizes = [1, 256], strides = [1, 1]} : vector<9x256xf32> to vector<1x256xf32>
    %21 = vector.broadcast %20 : vector<1x256xf32> to vector<4x256xf32>
    %22 = arith.mulf %19, %21 : vector<4x256xf32>
    %c241_i32 = arith.constant 241 : i32
    %23 = tpu.dynamic_rotate %1 by %c241_i32 dim 1 : vector<4x256xf32>, i32 -> vector<4x256xf32>
    %24 = vector.extract_strided_slice %2 {offsets = [6, 0], sizes = [1, 256], strides = [1, 1]} : vector<9x256xf32> to vector<1x256xf32>
    %25 = vector.broadcast %24 : vector<1x256xf32> to vector<4x256xf32>
    %26 = arith.mulf %23, %25 : vector<4x256xf32>
    %c240_i32 = arith.constant 240 : i32
    %27 = tpu.dynamic_rotate %1 by %c240_i32 dim 1 : vector<4x256xf32>, i32 -> vector<4x256xf32>
    %28 = vector.extract_strided_slice %2 {offsets = [7, 0], sizes = [1, 256], strides = [1, 1]} : vector<9x256xf32> to vector<1x256xf32>
    %29 = vector.broadcast %28 : vector<1x256xf32> to vector<4x256xf32>
    %30 = arith.mulf %27, %29 : vector<4x256xf32>
    %c239_i32 = arith.constant 239 : i32
    %31 = tpu.dynamic_rotate %1 by %c239_i32 dim 1 : vector<4x256xf32>, i32 -> vector<4x256xf32>
    %32 = vector.extract_strided_slice %2 {offsets = [8, 0], sizes = [1, 256], strides = [1, 1]} : vector<9x256xf32> to vector<1x256xf32>
    %33 = vector.broadcast %32 : vector<1x256xf32> to vector<4x256xf32>
    %34 = arith.mulf %31, %33 : vector<4x256xf32>
    %35 = tpu.concatenate %6, %10, %14, %18, %1, %22, %26, %30, %34 in 0 : vector<4x256xf32>, vector<4x256xf32>, vector<4x256xf32>, vector<4x256xf32>, vector<4x256xf32>, vector<4x256xf32>, vector<4x256xf32>, vector<4x256xf32>, vector<4x256xf32> -> vector<36x256xf32>
    %c0_4 = arith.constant 0 : index
    %c0_5 = arith.constant 0 : index
    %36 = vector.load %arg3[%c0_4, %c0_5] : memref<4x36xf32, #tpu.memory_space<vmem>>, vector<4x36xf32>
    %cst = arith.constant dense<0.000000e+00> : vector<4x256xf32>
    %37 = tpu.matmul %36, %35, %cst {dimension_numbers = #tpu.dot_dimension_numbers<[1], [0], [0], [1], [0, 0, 1, 1], [], []>} : vector<4x36xf32>, vector<36x256xf32>, vector<4x256xf32> -> vector<4x256xf32>
    %c0_6 = arith.constant 0 : index
    %c0_7 = arith.constant 0 : index
    %38 = vector.load %arg4[%c0_6, %c0_7] : memref<4x1xf32, #tpu.memory_space<vmem>>, vector<4x1xf32>
    %39 = vector.broadcast %38 : vector<4x1xf32> to vector<4x256xf32>
    %40 = arith.addf %37, %39 : vector<4x256xf32>
    %cst_8 = arith.constant 0.000000e+00 : f32
    %41 = vector.broadcast %cst_8 : f32 to vector<4x256xf32>
    %42 = arith.maximumf %40, %41 : vector<4x256xf32>
    %c17_i32_9 = arith.constant 17 : i32
    %43 = tpu.dynamic_rotate %42 by %c17_i32_9 dim 1 : vector<4x256xf32>, i32 -> vector<4x256xf32>
    %44 = vector.extract_strided_slice %2 {offsets = [0, 0], sizes = [1, 256], strides = [1, 1]} : vector<9x256xf32> to vector<1x256xf32>
    %45 = vector.broadcast %44 : vector<1x256xf32> to vector<4x256xf32>
    %46 = arith.mulf %43, %45 : vector<4x256xf32>
    %c16_i32_10 = arith.constant 16 : i32
    %47 = tpu.dynamic_rotate %42 by %c16_i32_10 dim 1 : vector<4x256xf32>, i32 -> vector<4x256xf32>
    %48 = vector.extract_strided_slice %2 {offsets = [1, 0], sizes = [1, 256], strides = [1, 1]} : vector<9x256xf32> to vector<1x256xf32>
    %49 = vector.broadcast %48 : vector<1x256xf32> to vector<4x256xf32>
    %50 = arith.mulf %47, %49 : vector<4x256xf32>
    %c15_i32_11 = arith.constant 15 : i32
    %51 = tpu.dynamic_rotate %42 by %c15_i32_11 dim 1 : vector<4x256xf32>, i32 -> vector<4x256xf32>
    %52 = vector.extract_strided_slice %2 {offsets = [2, 0], sizes = [1, 256], strides = [1, 1]} : vector<9x256xf32> to vector<1x256xf32>
    %53 = vector.broadcast %52 : vector<1x256xf32> to vector<4x256xf32>
    %54 = arith.mulf %51, %53 : vector<4x256xf32>
    %c1_i32_12 = arith.constant 1 : i32
    %55 = tpu.dynamic_rotate %42 by %c1_i32_12 dim 1 : vector<4x256xf32>, i32 -> vector<4x256xf32>
    %56 = vector.extract_strided_slice %2 {offsets = [3, 0], sizes = [1, 256], strides = [1, 1]} : vector<9x256xf32> to vector<1x256xf32>
    %57 = vector.broadcast %56 : vector<1x256xf32> to vector<4x256xf32>
    %58 = arith.mulf %55, %57 : vector<4x256xf32>
    %c255_i32_13 = arith.constant 255 : i32
    %59 = tpu.dynamic_rotate %42 by %c255_i32_13 dim 1 : vector<4x256xf32>, i32 -> vector<4x256xf32>
    %60 = vector.extract_strided_slice %2 {offsets = [5, 0], sizes = [1, 256], strides = [1, 1]} : vector<9x256xf32> to vector<1x256xf32>
    %61 = vector.broadcast %60 : vector<1x256xf32> to vector<4x256xf32>
    %62 = arith.mulf %59, %61 : vector<4x256xf32>
    %c241_i32_14 = arith.constant 241 : i32
    %63 = tpu.dynamic_rotate %42 by %c241_i32_14 dim 1 : vector<4x256xf32>, i32 -> vector<4x256xf32>
    %64 = vector.extract_strided_slice %2 {offsets = [6, 0], sizes = [1, 256], strides = [1, 1]} : vector<9x256xf32> to vector<1x256xf32>
    %65 = vector.broadcast %64 : vector<1x256xf32> to vector<4x256xf32>
    %66 = arith.mulf %63, %65 : vector<4x256xf32>
    %c240_i32_15 = arith.constant 240 : i32
    %67 = tpu.dynamic_rotate %42 by %c240_i32_15 dim 1 : vector<4x256xf32>, i32 -> vector<4x256xf32>
    %68 = vector.extract_strided_slice %2 {offsets = [7, 0], sizes = [1, 256], strides = [1, 1]} : vector<9x256xf32> to vector<1x256xf32>
    %69 = vector.broadcast %68 : vector<1x256xf32> to vector<4x256xf32>
    %70 = arith.mulf %67, %69 : vector<4x256xf32>
    %c239_i32_16 = arith.constant 239 : i32
    %71 = tpu.dynamic_rotate %42 by %c239_i32_16 dim 1 : vector<4x256xf32>, i32 -> vector<4x256xf32>
    %72 = vector.extract_strided_slice %2 {offsets = [8, 0], sizes = [1, 256], strides = [1, 1]} : vector<9x256xf32> to vector<1x256xf32>
    %73 = vector.broadcast %72 : vector<1x256xf32> to vector<4x256xf32>
    %74 = arith.mulf %71, %73 : vector<4x256xf32>
    %75 = tpu.concatenate %46, %50, %54, %58, %42, %62, %66, %70, %74 in 0 : vector<4x256xf32>, vector<4x256xf32>, vector<4x256xf32>, vector<4x256xf32>, vector<4x256xf32>, vector<4x256xf32>, vector<4x256xf32>, vector<4x256xf32>, vector<4x256xf32> -> vector<36x256xf32>
    %c0_17 = arith.constant 0 : index
    %c0_18 = arith.constant 0 : index
    %76 = vector.load %arg5[%c0_17, %c0_18] : memref<4x36xf32, #tpu.memory_space<vmem>>, vector<4x36xf32>
    %cst_19 = arith.constant dense<0.000000e+00> : vector<4x256xf32>
    %77 = tpu.matmul %76, %75, %cst_19 {dimension_numbers = #tpu.dot_dimension_numbers<[1], [0], [0], [1], [0, 0, 1, 1], [], []>} : vector<4x36xf32>, vector<36x256xf32>, vector<4x256xf32> -> vector<4x256xf32>
    %c0_20 = arith.constant 0 : index
    %c0_21 = arith.constant 0 : index
    %78 = vector.load %arg6[%c0_20, %c0_21] : memref<4x1xf32, #tpu.memory_space<vmem>>, vector<4x1xf32>
    %79 = vector.broadcast %78 : vector<4x1xf32> to vector<4x256xf32>
    %80 = arith.addf %77, %79 : vector<4x256xf32>
    %cst_22 = arith.constant 0.000000e+00 : f32
    %81 = vector.broadcast %cst_22 : f32 to vector<4x256xf32>
    %82 = arith.maximumf %80, %81 : vector<4x256xf32>
    %83 = arith.addf %1, %82 : vector<4x256xf32>
    %cst_23 = arith.constant 0.000000e+00 : f32
    %84 = vector.broadcast %cst_23 : f32 to vector<4x256xf32>
    %85 = arith.maximumf %83, %84 : vector<4x256xf32>
    %c0_24 = arith.constant 0 : index
    %c0_25 = arith.constant 0 : index
    %c0_26 = arith.constant 0 : index
    %86 = vector.load %arg7[%c0_24, %c0_25, %c0_26] : memref<1x4x256xf32, #tpu.memory_space<vmem>>, vector<1x4x256xf32>
    %87 = vector.shape_cast %86 : vector<1x4x256xf32> to vector<4x256xf32>
    %88 = vector.shape_cast %85 : vector<4x256xf32> to vector<1x4x256xf32>
    tpu.vector_store %arg7[%c0_24, %c0_25, %c0_26], %88 {strides = array<i32>} : memref<1x4x256xf32, #tpu.memory_space<vmem>>, vector<1x4x256xf32>,
    return
  }
  func.func @transform_0(%arg0: i32) -> (i32, i32, i32) {
    %c0_i32 = arith.constant 0 : i32
    %c0_i32_0 = arith.constant 0 : i32
    %c0_i32_1 = arith.constant 0 : i32
    return %arg0, %c0_i32, %c0_i32_0 : i32, i32, i32
  }
  func.func @transform_1(%arg0: i32) -> (i32, i32) {
    %c0_i32 = arith.constant 0 : i32
    %c0_i32_0 = arith.constant 0 : i32
    %c0_i32_1 = arith.constant 0 : i32
    return %c0_i32, %c0_i32_0 : i32, i32
  }
  func.func @transform_2(%arg0: i32) -> (i32, i32) {
    %c0_i32 = arith.constant 0 : i32
    %c0_i32_0 = arith.constant 0 : i32
    %c0_i32_1 = arith.constant 0 : i32
    return %c0_i32, %c0_i32_0 : i32, i32
  }
  func.func @transform_3(%arg0: i32) -> (i32, i32) {
    %c0_i32 = arith.constant 0 : i32
    %c0_i32_0 = arith.constant 0 : i32
    %c0_i32_1 = arith.constant 0 : i32
    return %c0_i32, %c0_i32_0 : i32, i32
  }
  func.func @transform_4(%arg0: i32) -> (i32, i32) {
    %c0_i32 = arith.constant 0 : i32
    %c0_i32_0 = arith.constant 0 : i32
    %c0_i32_1 = arith.constant 0 : i32
    return %c0_i32, %c0_i32_0 : i32, i32
  }
  func.func @transform_5(%arg0: i32) -> (i32, i32) {
    %c0_i32 = arith.constant 0 : i32
    %c0_i32_0 = arith.constant 0 : i32
    %c0_i32_1 = arith.constant 0 : i32
    return %c0_i32, %c0_i32_0 : i32, i32
  }
  func.func @transform_6(%arg0: i32) -> (i32, i32, i32) {
    %c0_i32 = arith.constant 0 : i32
    %c0_i32_0 = arith.constant 0 : i32
    %c0_i32_1 = arith.constant 0 : i32
    return %arg0, %c0_i32, %c0_i32_0 : i32, i32, i32
  }
}

</mosaic_0001>

<bundles_post_ra>
// kernel: resblock_pallas.1
= control target key start
LH: loop header
LB: loop body
LE: loop exit
PB: predicated region body
PF: predicated region fallthrough
CT: control target
= control target key end

     0   :  { %s796_s21 = smov 0   ;;  %s1077_s0 = inlined_call_operand.vmem [shape: f32[2,4,256], index: 0, kind: input, shape index: {}]   ;;  %s1078_s1 = inlined_call_operand.vmem [shape: f32[9,256], index: 1, kind: input, shape index: {}]   ;;  %s1079_s2 = inlined_call_operand.vmem [shape: f32[4,36], index: 2, kind: input, shape index: {}]   ;;  %s1080_s3 = inlined_call_operand.vmem [shape: f32[4,1], index: 3, kind: input, shape index: {}]   ;;  %s1081_s4 = inlined_call_operand.vmem [shape: f32[4,36], index: 4, kind: input, shape index: {}]   ;;  %s1082_s5 = inlined_call_operand.vmem [shape: f32[4,1], index: 5, kind: input, shape index: {}]   ;;  %s1083_s6 = inlined_call_operand.vmem [shape: f32[2,4,256], index: 6, kind: output, shape index: {}]  }
   0x1 LB: > { %s702_s22 = sadd.s32 4294967295, %s750_s21   ;;  %p706_p0 = scmp.ge.s32.totalorder %s750_s21, 1  ;;  %s750_s21 = sphi %s796_s21, %s16_s21  }
   0x2   : > { %p212_p1 = scmp.lt.s32.totalorder %s750_s21, 3 }
   0x4   : > { %p213_p2 = pnand %p706_p0, %p212_p1 }
   0x5   : > { %p242_p3 = scmp.lt.s32.totalorder (!%p213_p2), %s702_s22, 1  ;;  %s752_s27 = smov (!%p213_p2), 16  }
   0x6   : > { %216 = sbr.rel (%p213_p2) target bundleno = 645 (0x285), region = 44  ;;  %s753_s28 = smov (!%p213_p2), 15  }
   0x7   : > { %s754_s29 = smov (!%p213_p2), 1   ;;  %s755_s30 = smov (!%p213_p2), 127  }
   0x8   : > { %s756_s7 = smov (!%p213_p2), 113   ;;  %s757_s8 = smov (!%p213_p2), 112  }
   0x9   : > { %s758_s9 = smov (!%p213_p2), 17   ;;  %s759_s10 = smov (!%p213_p2), 111  }
   0xb   : > { %s1085_s22 = smov (!%p242_p3, %s702_s22), 1  ;;  %v267_v25 = vlaneseq  ;;  %v427_v27 = vld [vmem:[%s1080_s3] sm:$0xf]  ;;  %v760_v28 = vmov 0   ;;  %v858_v32 = vld [vmem:[%s1078_s1 + $0x8] sm:$0xff]  ;;  %vm417_vm6 = vcmask 1043456  }
   0xc   : > { %s721_s23 = sshll.u32 %s1085_s22, 3  ;;  %740 = vset.pattern.permute.xlu1 %v760_v28  ;;  %741 = vset.pattern.permute.xlu0 %v760_v28  ;;  %v852_v30 = vld [vmem:[%s1078_s1] sm:$0xff]  ;;  %v369_v38 = vperm.slane %v858_v32, 7  ;;  %v337_v42 = vperm.slane %v858_v32, 5  ;;  %v289_v43 = vperm.slane %v858_v32, 1  ;;  %v321_v49 = vperm.slane %v858_v32, 3 }
   0xd   : > { %s246_s26 = scalar_lea.vmem %s1077_s0, %s721_s23  ;;  %v846_v29 = vand.u32 127, %v267_v25  ;;  %v336_v33 = vperm.slane %v852_v30, 5  ;;  %v368_v37 = vperm.slane %v852_v30, 7  ;;  %v288_v41 = vperm.slane %v852_v30, 1  ;;  %v888_v50 = vld [vmem:[%s1078_s1 + $0x10] ss:$0 sm:$0xff] }
   0xe   : > { %v812_v0 = vld [vmem:[%s246_s26] sm:$0xff]  ;;  %v320_v44 = vperm.slane %v852_v30, 3  ;;  %v893_v51 = vld [vmem:[%s1078_s1 + $0x18] ss:$0 sm:$0xff]  ;;  %v352_v52 = vperm.slane %v852_v30, 6  ;;  %v353_v53 = vperm.slane %v858_v32, 6 }
   0xf   : > { %258 = vst [vmem:[#allocation1] ss:$2 sm:$0xff] %v812_v0  ;;  %vm333_vm0 = vcmp.lt.s32.totalorder %v846_v29, 127  ;;  %vm365_vm1 = vcmp.lt.s32.totalorder %v846_v29, 112  ;;  %vm317_vm2 = vcmp.lt.s32.totalorder %v846_v29, 1  ;;  %vm349_vm3 = vcmp.lt.s32.totalorder %v846_v29, 113 }
  0x10   : > { %vm381_vm4 = vcmp.lt.s32.totalorder %v846_v29, 111  ;;  %vm285_vm5 = vcmp.lt.s32.totalorder %v846_v29, 16  ;;  %vm269_vm7 = vcmp.lt.s32.totalorder %v846_v29, 17  ;;  %vm301_vm8 = vcmp.lt.s32.totalorder %v846_v29, 15  ;;  %v581_v29 = vld [vmem:[%s1081_s4] sm:$0xf] }
  0x11   : > { %vm433_vm9 = vcmask 293888  }
  0x16   : > { %v259_v1 = vld.sshfl [vmem:[#allocation1] sm:$0xff pattern:$0x75316420]  ;;  %v260_v2 = vld.sshfl [vmem:[#allocation1 + $0x8] sm:$0xff pattern:$0x75316420] }
  0x17   : > { %276 = vst [vmem:[#allocation1] ss:$2 sm:$0xff] %v812_v0 }
  0x1e   : > { %v277_v3 = vld.sshfl [vmem:[#allocation1] sm:$0xff pattern:$0x75316420]  ;;  %v278_v4 = vld.sshfl [vmem:[#allocation1 + $0x8] sm:$0xff pattern:$0x75316420] }
  0x1f   : > { %292 = vst [vmem:[#allocation1] ss:$2 sm:$0xff] %v812_v0  ;;  %281 = vrot.lane.b32.xlu1 %v277_v3, %s752_s27  ;;  %283 = vrot.lane.b32.xlu2 %v278_v4, %s752_s27 }
  0x26   : > { %v293_v5 = vld.sshfl [vmem:[#allocation1] sm:$0xff pattern:$0x75316420]  ;;  %v294_v6 = vld.sshfl [vmem:[#allocation1 + $0x8] sm:$0xff pattern:$0x75316420] }
  0x27   : > { %297 = vrot.lane.b32.xlu0 %v293_v5, %s753_s28  ;;  %308 = vst [vmem:[#allocation1] ss:$2 sm:$0xff] %v812_v0 }
  0x2e   : > { %v310_v7 = vld.sshfl [vmem:[#allocation1 + $0x8] sm:$0xff pattern:$0x75316420]  ;;  %v309_v8 = vld.sshfl [vmem:[#allocation1] sm:$0xff pattern:$0x75316420] }
  0x2f   : > { %315 = vrot.lane.b32.xlu0 %v310_v7, %s754_s29  ;;  %324 = vst [vmem:[#allocation1] ss:$2 sm:$0xff] %v812_v0  ;;  %313 = vrot.lane.b32.xlu2 %v309_v8, %s754_s29 }
  0x36   : > { %v325_v9 = vld.sshfl [vmem:[#allocation1] sm:$0xff pattern:$0x75316420]  ;;  %v326_v10 = vld.sshfl [vmem:[#allocation1 + $0x8] sm:$0xff pattern:$0x75316420] }
  0x37   : > { %340 = vst [vmem:[#allocation1] ss:$2 sm:$0xff] %v812_v0  ;;  %329 = vrot.lane.b32.xlu2 %v325_v9, %s755_s30 }
  0x3e   : > { %v341_v11 = vld.sshfl [vmem:[#allocation1] sm:$0xff pattern:$0x75316420]  ;;  %v342_v12 = vld.sshfl [vmem:[#allocation1 + $0x8] sm:$0xff pattern:$0x75316420] }
  0x3f   : > { %345 = vrot.lane.b32.xlu0 %v341_v11, %s756_s7  ;;  %347 = vrot.lane.b32.xlu1 %v342_v12, %s756_s7  ;;  %356 = vst [vmem:[#allocation1] ss:$2 sm:$0xff] %v812_v0 }
  0x40   : > { %331 = vrot.lane.b32.xlu2 %v326_v10, %s755_s30 }
  0x46   : > { %v357_v13 = vld.sshfl [vmem:[#allocation1] sm:$0xff pattern:$0x75316420]  ;;  %v358_v14 = vld.sshfl [vmem:[#allocation1 + $0x8] sm:$0xff pattern:$0x75316420] }
  0x47   : > { %361 = vrot.lane.b32.xlu0 %v357_v13, %s757_s8  ;;  %372 = vst [vmem:[#allocation1] ss:$2 sm:$0xff] %v812_v0 }
  0x48   : > { %263 = vrot.lane.b32.xlu2 %v259_v1, %s758_s9 }
  0x4e   : > { %v373_v15 = vld.sshfl [vmem:[#allocation1] sm:$0xff pattern:$0x75316420]  ;;  %v374_v16 = vld.sshfl [vmem:[#allocation1 + $0x8] sm:$0xff pattern:$0x75316420] }
  0x4f   : > { %363 = vrot.lane.b32.xlu0 %v358_v14, %s757_s8  ;;  %377 = vrot.lane.b32.xlu1 %v373_v15, %s759_s10  ;;  %400 = vst [vmem:[#allocation1] ss:$2 sm:$0xff] %v812_v0  ;;  %v272_v15 = vperm.slane %v852_v30, 0 }
  0x56   : > { %v401_v12 = vld.sshfl [vmem:[#allocation1] sm:$0xff pattern:$0x75316420]  ;;  %v402_v13 = vld.sshfl [vmem:[#allocation1 + $0x8] sm:$0xff pattern:$0x75316420] }
  0x57   : > { %265 = vrot.lane.b32.xlu0 %v260_v2, %s758_s9  ;;  %379 = vrot.lane.b32.xlu1 %v374_v16, %s759_s10 }
  0x5f   : > { %299 = vrot.lane.b32.xlu1 %v294_v6, %s753_s28 }
  0x67   : > { %430 = vperm.xlu1 %740, %v427_v27  }
  0x79   : > { %v841_v18 = vpop.permute.xlu2 %283 }
  0x89   : > { %v314_v20 = vpop.permute.xlu2 %313 }
  0x91   : > { %v282_v21 = vpop.permute.xlu1 %281  ;;  %v330_v23 = vpop.permute.xlu2 %329 }
  0x92   : > { %v286_v7 = vsel %vm285_vm5, %v282_v21, %v841_v18  ;;  %v287_v8 = vsel %vm285_vm5, %v841_v18, %v282_v21  ;;  %v305_v21 = vperm.slane %v858_v32, 2 }
  0x93   : > { %v291_v27 = vmul.f32 %v289_v43, %v286_v7 }
  0x99   : > { %v839_v17 = vpop.permute.xlu0 %297 }
  0x9a   : > { %v332_v31 = vpop.permute.xlu2 %331 }
  0x9b   : > { %v334_v36 = vsel %vm333_vm0, %v330_v23, %v332_v31  ;;  %v335_v45 = vsel %vm333_vm0, %v332_v31, %v330_v23 }
  0x9c   : > { %v338_v46 = vmul.f32 %v336_v33, %v334_v36  ;;  %v339_v54 = vmul.f32 %v337_v42, %v335_v45 }
  0x9e   : > { %v407_v58 = vrot.slane %v338_v46, 4  ;;  %v408_v6 = vrot.slane %v339_v54, 4 }
  0xa0   : > { %v423_v25 = vsel %vm417_vm6, %v402_v13, %v408_v6  ;;  %v582_v13 = vld [vmem:[%s1082_s5] sm:$0xf] }
  0xa1   : > { %v316_v19 = vpop.permute.xlu0 %315 }
  0xa2   : > { %v319_v55 = vsel %vm317_vm2, %v316_v19, %v314_v20  ;;  %v318_v1 = vsel %vm317_vm2, %v314_v20, %v316_v19  ;;  %v264_v10 = vpop.permute.xlu2 %263  ;;  %v273_v19 = vperm.slane %v858_v32, 0  ;;  %v304_v20 = vperm.slane %v852_v30, 2 }
  0xa3   : > { %v322_v9 = vmul.f32 %v320_v44, %v319_v55  ;;  %v323_v14 = vmul.f32 %v321_v49, %v318_v1 }
  0xa5   : > { %v396_v31 = vrot.slane %v322_v9, 4 }
  0xb1   : > { %v346_v22 = vpop.permute.xlu0 %345  ;;  %v348_v24 = vpop.permute.xlu1 %347 }
  0xb2   : > { %v350_v56 = vsel %vm349_vm3, %v346_v22, %v348_v24  ;;  %v351_v57 = vsel %vm349_vm3, %v348_v24, %v346_v22  ;;  %v422_v24 = vsel %vm417_vm6, %v401_v12, %v407_v58 }
  0xb3   : > { %v354_v4 = vmul.f32 %v352_v52, %v350_v56  ;;  %v355_v5 = vmul.f32 %v353_v53, %v351_v57 }
  0xb9   : > { %v362_v26 = vpop.permute.xlu0 %361 }
  0xc1   : > { %v364_v34 = vpop.permute.xlu0 %363  ;;  %v378_v35 = vpop.permute.xlu1 %377 }
  0xc2   : > { %v366_v39 = vsel %vm365_vm1, %v362_v26, %v364_v34  ;;  %v367_v40 = vsel %vm365_vm1, %v364_v34, %v362_v26  ;;  %v290_v26 = vmul.f32 %v288_v41, %v287_v8  ;;  %v397_v34 = vrot.slane %v323_v14, 4 }
  0xc3   : > { %v370_v47 = vmul.f32 %v368_v37, %v366_v39  ;;  %v371_v48 = vmul.f32 %v369_v38, %v367_v40 }
  0xc5   : > { %v413_v60 = vrot.slane %v370_v47, 4  ;;  %v414_v61 = vrot.slane %v371_v48, 4  ;;  %v390_v47 = vrot.slane %v290_v26, 4  ;;  %v391_v48 = vrot.slane %v291_v27, 4 }
  0xc7   : > { %v424_v16 = vsel %vm417_vm6, %v354_v4, %v413_v60  ;;  %v425_v18 = vsel %vm417_vm6, %v355_v5, %v414_v61 }
  0xc9   : > { %v380_v59 = vpop.permute.xlu1 %379  ;;  %v266_v11 = vpop.permute.xlu0 %265 }
  0xca   : > { %v382_v62 = vsel %vm381_vm4, %v378_v35, %v380_v59  ;;  %v383_v63 = vsel %vm381_vm4, %v380_v59, %v378_v35  ;;  %v270_v22 = vsel %vm269_vm7, %v264_v10, %v266_v11  ;;  %v271_v23 = vsel %vm269_vm7, %v266_v11, %v264_v10 }
  0xcb   : > { %v386_v2 = vmul.f32 %v888_v50, %v382_v62  ;;  %v387_v3 = vmul.f32 %v893_v51, %v383_v63  ;;  %v274_v39 = vmul.f32 %v272_v15, %v271_v23  ;;  %v275_v40 = vmul.f32 %v273_v19, %v270_v22 }
  0xcd   : > { %711 = vmatpush.msk.msra.mxu0 %vm417_vm6, %v386_v2  ;;  %713 = vmatpush.msk.msra.mxu1 %vm417_vm6, %v387_v3  ;;  %v418_v56 = vsel %vm417_vm6, %v274_v39, %v390_v47  ;;  %v419_v57 = vsel %vm417_vm6, %v275_v40, %v391_v48 }
  0xcf   : > { %455 = vmatpush.msra.mxu0 %v424_v16  ;;  %475 = vmatpush.msra.mxu1 %v425_v18 }
  0xd1   : > { %v300_v28 = vpop.permute.xlu1 %299  ;;  %456 = vmatpush.msra.mxu0 %v422_v24  ;;  %476 = vmatpush.msra.mxu1 %v423_v25 }
  0xd2   : > { %v302_v35 = vsel %vm301_vm8, %v839_v17, %v300_v28  ;;  %v303_v36 = vsel %vm301_vm8, %v300_v28, %v839_v17  ;;  %v426_v17 = vld [vmem:[%s1079_s2] sm:$0xf] }
  0xd3   : > { %v306_v45 = vmul.f32 %v304_v20, %v303_v36  ;;  %v307_v46 = vmul.f32 %v305_v21, %v302_v35 }
  0xd5   : > { %v420_v54 = vsel %vm417_vm6, %v306_v45, %v396_v31  ;;  %v421_v55 = vsel %vm417_vm6, %v307_v46, %v397_v34 }
  0xd6   : > { %457 = vmatpush.msra.mxu0 %v420_v54  ;;  %477 = vmatpush.msra.mxu1 %v421_v55 }
  0xd8   : > { %458 = vmatpush.msra.mxu0 %v418_v56  ;;  %478 = vmatpush.msra.mxu1 %v419_v57 }
  0xd9   : > { %712 = vmatmul.msk.f32.vlgmr.msra.gmra.mxu0 %vm433_vm9, %v426_v17  ;;  %714 = vmatmul.msk.f32.vlgmr.msra.gmra.mxu1 %vm433_vm9, %v426_v17  ;;  %v431_v58 = vpop.permute.xlu1 %430 }
 0x156   : > { %v460_v59 = vpop.f32.mrf.mxu0  ;;  %v480_v60 = vpop.f32.mrf.mxu1 }
 0x157   : > { %v461_v61 = vadd.f32 %v460_v59, %v431_v58  ;;  %v481_v62 = vadd.f32 %v480_v60, %v431_v58 }
 0x159   : > { %v483_v63 = vmax.f32 %v461_v61, 0.0  ;;  %v484_v1 = vmax.f32 %v481_v62, 0.0 }
 0x15b   : > { %535 = vrot.lane.b32.xlu0 %v484_v1, %s757_s8  ;;  %541 = vrot.lane.b32.xlu1 %v483_v63, %s759_s10 }
 0x15c   : > { %533 = vrot.lane.b32.xlu2 %v483_v63, %s757_s8  ;;  %s251_s8 = scalar_lea.vmem %s1083_s6, %s721_s23 }
 0x163   : > { %517 = vrot.lane.b32.xlu0 %v483_v63, %s755_s30  ;;  %519 = vrot.lane.b32.xlu1 %v484_v1, %s755_s30 }
 0x164   : > { %543 = vrot.lane.b32.xlu2 %v484_v1, %s759_s10 }
 0x16b   : > { %527 = vrot.lane.b32.xlu0 %v484_v1, %s756_s7  ;;  %509 = vrot.lane.b32.xlu1 %v483_v63, %s754_s29 }
 0x16c   : > { %525 = vrot.lane.b32.xlu2 %v483_v63, %s756_s7 }
 0x173   : > { %493 = vrot.lane.b32.xlu0 %v483_v63, %s752_s27  ;;  %495 = vrot.lane.b32.xlu1 %v484_v1, %s752_s27 }
 0x174   : > { %511 = vrot.lane.b32.xlu2 %v484_v1, %s754_s29 }
 0x17b   : > { %503 = vrot.lane.b32.xlu0 %v484_v1, %s753_s28  ;;  %485 = vrot.lane.b32.xlu1 %v483_v63, %s758_s9 }
 0x17c   : > { %501 = vrot.lane.b32.xlu2 %v483_v63, %s753_s28 }
 0x183   : > { %585 = vperm.xlu0 %741, %v582_v13  }
 0x184   : > { %487 = vrot.lane.b32.xlu2 %v484_v1, %s758_s9 }
 0x1b6   : > { %v534_v2 = vpop.permute.xlu2 %533 }
 0x1be   : > { %v544_v3 = vpop.permute.xlu2 %543 }
 0x1c6   : > { %v526_v6 = vpop.permute.xlu2 %525 }
 0x1cd   : > { %v536_v4 = vpop.permute.xlu0 %535  ;;  %v542_v5 = vpop.permute.xlu1 %541 }
 0x1ce   : > { %v545_v7 = vsel %vm381_vm4, %v542_v5, %v544_v3  ;;  %v546_v8 = vsel %vm381_vm4, %v544_v3, %v542_v5  ;;  %v537_v14 = vsel %vm365_vm1, %v534_v2, %v536_v4  ;;  %v538_v16 = vsel %vm365_vm1, %v536_v4, %v534_v2 }
 0x1cf   : > { %v547_v9 = vmul.f32 %v888_v50, %v545_v7  ;;  %v548_v10 = vmul.f32 %v893_v51, %v546_v8  ;;  %v512_v50 = vpop.permute.xlu2 %511  ;;  %v539_v22 = vmul.f32 %v537_v14, %v368_v37  ;;  %v540_v23 = vmul.f32 %v538_v16, %v369_v38 }
 0x1d1   : > { %715 = vmatpush.msk.msra.mxu2 %vm417_vm6, %v547_v9  ;;  %717 = vmatpush.msk.msra.mxu3 %vm417_vm6, %v548_v10  ;;  %v569_v28 = vrot.slane %v539_v22, 4  ;;  %v570_v31 = vrot.slane %v540_v23, 4 }
 0x1d5   : > { %v518_v11 = vpop.permute.xlu0 %517  ;;  %v520_v12 = vpop.permute.xlu1 %519 }
 0x1d6   : > { %v521_v51 = vsel %vm333_vm0, %v518_v11, %v520_v12  ;;  %v522_v18 = vsel %vm333_vm0, %v520_v12, %v518_v11 }
 0x1d7   : > { %v523_v24 = vmul.f32 %v521_v51, %v336_v33  ;;  %v524_v25 = vmul.f32 %v522_v18, %v337_v42  ;;  %v502_v40 = vpop.permute.xlu2 %501 }
 0x1d9   : > { %v563_v37 = vrot.slane %v523_v24, 4  ;;  %v564_v36 = vrot.slane %v524_v25, 4 }
 0x1db   : > { %v577_v45 = vsel %vm417_vm6, %v483_v63, %v563_v37  ;;  %v578_v46 = vsel %vm417_vm6, %v484_v1, %v564_v36 }
 0x1dd   : > { %v528_v26 = vpop.permute.xlu0 %527  ;;  %v510_v27 = vpop.permute.xlu1 %509 }
 0x1de   : > { %v529_v34 = vsel %vm349_vm3, %v526_v6, %v528_v26  ;;  %v530_v35 = vsel %vm349_vm3, %v528_v26, %v526_v6 }
 0x1df   : > { %v531_v38 = vmul.f32 %v529_v34, %v352_v52  ;;  %v532_v33 = vmul.f32 %v530_v35, %v353_v53  ;;  %v513_v52 = vsel %vm317_vm2, %v510_v27, %v512_v50  ;;  %v514_v53 = vsel %vm317_vm2, %v512_v50, %v510_v27  ;;  %v488_v57 = vpop.permute.xlu2 %487 }
 0x1e0   : > { %v515_v54 = vmul.f32 %v514_v53, %v320_v44  ;;  %v516_v55 = vmul.f32 %v513_v52, %v321_v49 }
 0x1e1   : > { %v579_v42 = vsel %vm417_vm6, %v531_v38, %v569_v28  ;;  %v580_v39 = vsel %vm417_vm6, %v532_v33, %v570_v31 }
 0x1e2   : > { %609 = vmatpush.msra.mxu2 %v579_v42  ;;  %629 = vmatpush.msra.mxu3 %v580_v39  ;;  %v557_v58 = vrot.slane %v515_v54, 4  ;;  %v558_v59 = vrot.slane %v516_v55, 4 }
 0x1e4   : > { %610 = vmatpush.msra.mxu2 %v577_v45  ;;  %630 = vmatpush.msra.mxu3 %v578_v46 }
 0x1e5   : > { %v494_v47 = vpop.permute.xlu0 %493  ;;  %v496_v48 = vpop.permute.xlu1 %495 }
 0x1e6   : > { %v497_v17 = vsel %vm285_vm5, %v494_v47, %v496_v48  ;;  %v498_v56 = vsel %vm285_vm5, %v496_v48, %v494_v47 }
 0x1e7   : > { %v499_v60 = vmul.f32 %v498_v56, %v288_v41  ;;  %v500_v61 = vmul.f32 %v497_v17, %v289_v43 }
 0x1e9   : > { %v551_v5 = vrot.slane %v499_v60, 4  ;;  %v552_v6 = vrot.slane %v500_v61, 4 }
 0x1ed   : > { %v504_v62 = vpop.permute.xlu0 %503  ;;  %v486_v44 = vpop.permute.xlu1 %485 }
 0x1ee   : > { %v505_v49 = vsel %vm301_vm8, %v502_v40, %v504_v62  ;;  %v506_v63 = vsel %vm301_vm8, %v504_v62, %v502_v40  ;;  %v489_v1 = vsel %vm269_vm7, %v486_v44, %v488_v57  ;;  %v490_v2 = vsel %vm269_vm7, %v488_v57, %v486_v44 }
 0x1ef   : > { %v507_v41 = vmul.f32 %v506_v63, %v304_v20  ;;  %v508_v43 = vmul.f32 %v505_v49, %v305_v21  ;;  %v491_v3 = vmul.f32 %v490_v2, %v272_v15  ;;  %v492_v4 = vmul.f32 %v489_v1, %v273_v19 }
 0x1f1   : > { %v575_v7 = vsel %vm417_vm6, %v507_v41, %v557_v58  ;;  %v576_v8 = vsel %vm417_vm6, %v508_v43, %v558_v59  ;;  %v573_v20 = vsel %vm417_vm6, %v491_v3, %v551_v5  ;;  %v574_v30 = vsel %vm417_vm6, %v492_v4, %v552_v6 }
 0x1f2   : > { %611 = vmatpush.msra.mxu2 %v575_v7  ;;  %631 = vmatpush.msra.mxu3 %v576_v8 }
 0x1f4   : > { %612 = vmatpush.msra.mxu2 %v573_v20  ;;  %632 = vmatpush.msra.mxu3 %v574_v30 }
 0x1f5   : > { %716 = vmatmul.msk.f32.vlgmr.msra.gmra.mxu2 %vm433_vm9, %v581_v29  ;;  %718 = vmatmul.msk.f32.vlgmr.msra.gmra.mxu3 %vm433_vm9, %v581_v29  ;;  %v586_v32 = vpop.permute.xlu0 %585 }
 0x278   : > { %v614_v15 = vpop.f32.mrf.mxu2  ;;  %v634_v19 = vpop.f32.mrf.mxu3 }
 0x279   : > { %v615_v21 = vadd.f32 %v614_v15, %v586_v32  ;;  %v635_v9 = vadd.f32 %v634_v19, %v586_v32 }
 0x27b   : > { %v638_v10 = vmax.f32 %v635_v9, 0.0  ;;  %v637_v11 = vmax.f32 %v615_v21, 0.0 }
 0x27d   : > { %v641_v12 = vrot.slane %v638_v10, 4 }
 0x27f   : > { %v642_v13 = vsel %vm417_vm6, %v637_v11, %v641_v12 }
 0x280   : > { %v644_v14 = vadd.f32 %v642_v13, %v812_v0 }
 0x282   : > { %v645_v16 = vmax.f32 %v644_v14, 0.0 }
 0x284   : > { %646 = vst [vmem:[%s251_s8] sm:$0xff] %v645_v16 }
 0x285 PF: > { %s16_s21 = sadd.s32 1, %s750_s21  }
 0x286   : > { %p13_p4 = scmp.ge.s32.totalorder %s16_s21, 4  }
 0x288   :  { %15 = sbr.rel (!%p13_p4) target bundleno = 1 (0x1), region = 74 }

</bundles_post_ra>
